<compile_context>
chip_gen: v5e
topology: v5e:2x2
jax: 0.10.0
libtpu: 0.0.40
codegen_flags: <defaults>
</compile_context>

<pallas_src>
import jax
import jax.numpy as jnp
from jax.experimental import pallas as pl
from jax.experimental.pallas import tpu as pltpu

# ----------------------------- configuration ---------------------------------
N = 2        # batch
C1 = 4       # input channels (both fused inputs)
C2 = 4       # output channels of the 1x1 conv
H = W = 16   # spatial
EPS = 1e-4   # BiFPN epsilon (matches the PyTorch module)


# ----------------------------- Pallas kernel ----------------------------------
def _bifpn_add2_kernel(w_ref, x0_ref, x1_ref, wblk_ref, b_ref, o_ref):
    """Fused: weight-normalize -> weighted add -> SiLU -> 1x1 conv (+bias).

    w_ref   : (2,)           SMEM  learnable fusion weights (un-normalized)
    x0_ref  : (N*C1, HW)     VMEM  input[0], batch folded into sublanes
    x1_ref  : (N*C1, HW)     VMEM  input[1]
    wblk_ref: (N*C2, N*C1)   VMEM  block-diagonal 1x1-conv weight
    b_ref   : (N*C2, 1)      VMEM  conv bias, packed per batch item
    o_ref   : (N*C2, HW)     VMEM  output
    """
    # Normalize the two fusion weights once: one reciprocal, two scalar muls.
    # (Note: the PyTorch module does NOT ReLU/clamp w before normalizing; we
    #  match that exactly.)
    inv = 1.0 / (w_ref[0] + w_ref[1] + EPS)
    w0 = w_ref[0] * inv
    w1 = w_ref[1] * inv

    # Weighted add + SiLU on the fully packed (8, 256) slab: full f32 vregs.
    y = w0 * x0_ref[...] + w1 * x1_ref[...]
    y = y * jax.nn.sigmoid(y)                      # SiLU (EUP + VPU)

    # 1x1 conv for the WHOLE batch as one block-diagonal matmul, f32 accumulate.
    out = jnp.dot(wblk_ref[...], y, preferred_element_type=jnp.float32)
    o_ref[...] = (out + b_ref[...]).astype(o_ref.dtype)


# ----------------------------- wrapper -----------------------------------------
def bifpn_add2_forward(params, x0_nchw, x1_nchw):
    n, c1, h, w = x0_nchw.shape
    hw = h * w
    c2 = params["conv_w"].shape[0]

    # Free reshapes: NCHW is contiguous as (N*C, H*W); H*W becomes the lane dim
    # and batch*channels fill the sublanes (8 of 8 used for N=2, C=4).
    x0 = x0_nchw.reshape(n * c1, hw).astype(jnp.float32)
    x1 = x1_nchw.reshape(n * c1, hw).astype(jnp.float32)

    # Block-diagonal conv weight: kron(I_N, Wconv) -> (N*C2, N*C1). One tiny
    # parameter transform in the wrapper lets a single matmul cover the batch.
    wm = params["conv_w"].reshape(c2, c1).astype(jnp.float32)
    wblk = jnp.kron(jnp.eye(n, dtype=jnp.float32), wm)            # (N*C2, N*C1)
    bias = jnp.tile(params["conv_b"].astype(jnp.float32), n).reshape(n * c2, 1)

    out = pl.pallas_call(
        _bifpn_add2_kernel,
        out_shape=jax.ShapeDtypeStruct((n * c2, hw), jnp.float32),
        # No grid: single step, whole arrays resident in VMEM/SMEM.
        in_specs=[
            pl.BlockSpec(memory_space=pltpu.MemorySpace.SMEM),    # fusion weights (2,)
            pl.BlockSpec(memory_space=pltpu.MemorySpace.VMEM),    # x0 packed
            pl.BlockSpec(memory_space=pltpu.MemorySpace.VMEM),    # x1 packed
            pl.BlockSpec(memory_space=pltpu.MemorySpace.VMEM),    # block-diag conv weight
            pl.BlockSpec(memory_space=pltpu.MemorySpace.VMEM),    # packed bias
        ],
        out_specs=pl.BlockSpec(memory_space=pltpu.MemorySpace.VMEM),
    )(params["w"].astype(jnp.float32), x0, x1, wblk, bias)

    return out.reshape(n, c2, h, w)


# ----------------------------- reference & init --------------------------------
def bifpn_add2_reference(params, x0, x1):
    wt = params["w"] / (jnp.sum(params["w"]) + EPS)
    y = wt[0] * x0 + wt[1] * x1
    y = y * jax.nn.sigmoid(y)
    wm = params["conv_w"].reshape(params["conv_w"].shape[0], -1)
    out = jnp.einsum("oc,nchw->nohw", wm, y) + params["conv_b"].reshape(1, -1, 1, 1)
    return out


def init_params(key):
    k1, k2 = jax.random.split(key, 2)
    return {
        "w": jnp.ones((2,), jnp.float32),                                    # nn.Parameter(ones(2))
        "conv_w": 0.1 * jax.random.normal(k1, (C2, C1, 1, 1), jnp.float32),  # Conv2d weight
        "conv_b": 0.1 * jax.random.normal(k2, (C2,), jnp.float32),           # Conv2d bias
    }


# ----------------------------- main ---------------------------------------------
if __name__ == "__main__":
    key = jax.random.PRNGKey(0)
    k0, k1, kp = jax.random.split(key, 3)
    x0 = jax.random.normal(k0, (N, C1, H, W), jnp.float32)   # x[0], NCHW
    x1 = jax.random.normal(k1, (N, C1, H, W), jnp.float32)   # x[1], NCHW
    params = init_params(kp)

    out = jax.jit(bifpn_add2_forward)(params, x0, x1)
    out = jax.block_until_ready(out)

    assert out.shape == (N, C2, H, W), out.shape
    assert bool(jnp.all(jnp.isfinite(out)))

    ref = bifpn_add2_reference(params, x0, x1)
    assert bool(jnp.allclose(out, ref, rtol=1e-3, atol=1e-3)), \
        float(jnp.max(jnp.abs(out - ref)))

    print("KERNEL_OK")
</pallas_src>

<mosaic_0001>
module attributes {stable_mosaic.version = 11 : i64} {
  func.func @_bifpn_add2_kernel(%arg0: memref<2xf32, #tpu.memory_space<smem>>, %arg1: memref<8x256xf32, #tpu.memory_space<vmem>>, %arg2: memref<8x256xf32, #tpu.memory_space<vmem>>, %arg3: memref<8x8xf32, #tpu.memory_space<vmem>>, %arg4: memref<8x1xf32, #tpu.memory_space<vmem>>, %arg5: memref<8x256xf32, #tpu.memory_space<vmem>>) attributes {dimension_semantics = [], scalar_prefetch = 0 : i64, scratch_operands = 0 : i64, tpu.core_type = #tpu.core_type<tc>} {
    %c0 = arith.constant 0 : index
    %0 = memref.load %arg0[%c0] : memref<2xf32, #tpu.memory_space<smem>>
    %c1 = arith.constant 1 : index
    %1 = memref.load %arg0[%c1] : memref<2xf32, #tpu.memory_space<smem>>
    %2 = arith.addf %0, %1 : f32
    %cst = arith.constant 9.99999974E-5 : f32
    %3 = arith.addf %2, %cst : f32
    %cst_0 = arith.constant 1.000000e+00 : f32
    %4 = arith.divf %cst_0, %3 : f32
    %c0_1 = arith.constant 0 : index
    %5 = memref.load %arg0[%c0_1] : memref<2xf32, #tpu.memory_space<smem>>
    %6 = arith.mulf %5, %4 : f32
    %c1_2 = arith.constant 1 : index
    %7 = memref.load %arg0[%c1_2] : memref<2xf32, #tpu.memory_space<smem>>
    %8 = arith.mulf %7, %4 : f32
    %c0_3 = arith.constant 0 : index
    %c0_4 = arith.constant 0 : index
    %9 = vector.load %arg1[%c0_3, %c0_4] : memref<8x256xf32, #tpu.memory_space<vmem>>, vector<8x256xf32>
    %10 = vector.broadcast %6 : f32 to vector<8x256xf32>
    %11 = arith.mulf %10, %9 : vector<8x256xf32>
    %c0_5 = arith.constant 0 : index
    %c0_6 = arith.constant 0 : index
    %12 = vector.load %arg2[%c0_5, %c0_6] : memref<8x256xf32, #tpu.memory_space<vmem>>, vector<8x256xf32>
    %13 = vector.broadcast %8 : f32 to vector<8x256xf32>
    %14 = arith.mulf %13, %12 : vector<8x256xf32>
    %15 = arith.addf %11, %14 : vector<8x256xf32>
    %16 = arith.negf %15 : vector<8x256xf32>
    %17 = math.exp %16 : vector<8x256xf32>
    %cst_7 = arith.constant 1.000000e+00 : f32
    %18 = vector.broadcast %cst_7 : f32 to vector<8x256xf32>
    %19 = arith.addf %18, %17 : vector<8x256xf32>
    %20 = arith.divf %18, %19 : vector<8x256xf32>
    %21 = arith.mulf %15, %20 : vector<8x256xf32>
    %c0_8 = arith.constant 0 : index
    %c0_9 = arith.constant 0 : index
    %22 = vector.load %arg3[%c0_8, %c0_9] : memref<8x8xf32, #tpu.memory_space<vmem>>, vector<8x8xf32>
    %cst_10 = arith.constant dense<0.000000e+00> : vector<8x256xf32>
    %23 = tpu.matmul %22, %21, %cst_10 {dimension_numbers = #tpu.dot_dimension_numbers<[1], [0], [0], [1], [0, 0, 1, 1], [], []>} : vector<8x8xf32>, vector<8x256xf32>, vector<8x256xf32> -> vector<8x256xf32>
    %c0_11 = arith.constant 0 : index
    %c0_12 = arith.constant 0 : index
    %24 = vector.load %arg4[%c0_11, %c0_12] : memref<8x1xf32, #tpu.memory_space<vmem>>, vector<8x1xf32>
    %25 = vector.broadcast %24 : vector<8x1xf32> to vector<8x256xf32>
    %26 = arith.addf %23, %25 : vector<8x256xf32>
    %c0_13 = arith.constant 0 : index
    %c0_14 = arith.constant 0 : index
    %27 = vector.load %arg5[%c0_13, %c0_14] : memref<8x256xf32, #tpu.memory_space<vmem>>, vector<8x256xf32>
    tpu.vector_store %arg5[%c0_13, %c0_14], %26 {strides = array<i32>} : memref<8x256xf32, #tpu.memory_space<vmem>>, vector<8x256xf32>,
    return
  }
}

</mosaic_0001>

<bundles_post_ra>
// kernel: tile.8
= control target key start
LH: loop header
LB: loop body
LE: loop exit
PB: predicated region body
PF: predicated region fallthrough
CT: control target
= control target key end

     0   :  { %2 = vsyncpa [#allocation1], 0  ;;  %s48_s8 = smov [#allocation0]   ;;  %s65_s0 = inlined_call_operand.hbm [shape: f32[4], index: 0, kind: input, shape index: {}]   ;;  %s66_s1 = inlined_call_operand.vmem [shape: f32[2,4], index: 1, kind: output, shape index: {}]  }
   0x1   :  { %s8_s0 = sshll.u32 %s65_s0, 4  ;;  %s10_s9 = sshll.u32 %s48_s8, 4  ;;  %s9_s0 = int_to_ptr.hbm [resolvable:$true] %s8_s0  ;;  %s11_s9 = int_to_ptr.vmem [resolvable:$true] %s10_s9 }
   0x2   :  { %13 = dma.hbm_to_vmem [thread:$0]  %s9_s0, 16, %s11_s9, [#allocation1]  }
   0x3   :  { %46 = dma.done.wait [#allocation1], 16  }
   0x4   :  { %47 = vsyncadd [#allocation1], 4294967280  ;;  %v18_v0 = vld [vmem:[#allocation0] ss:$0 sm:$0xff] }
   0x5   :  { %19 = vst [vmem:[%s66_s1] sm:$0x3] %v18_v0 }
   0x6   :  { %20 = vsyncpa [#allocation1], 1 }

// kernel: tile.0
= control target key start
LH: loop header
LB: loop body
LE: loop exit
PB: predicated region body
PF: predicated region fallthrough
CT: control target
= control target key end

     0   :  { %s34_s8 = smov 125   ;;  %s35_s9 = smov 126   ;;  %vm7_vm0 = vcmask 7168   ;;  %s61_s0 = inlined_call_operand.vmem [shape: f32[2,4], index: 0, kind: input, shape index: {}]   ;;  %s62_s1 = inlined_call_operand.vmem [shape: f32[8,1], index: 1, kind: output, shape index: {}]  }
   0x1   :  { %v4_v0 = vld [vmem:[%s61_s0] sm:$0x3]  ;;  %s33_s0 = smov 127  }
   0x2   :  { %5 = vst [vmem:[#allocation0] sm:$0x3] %v4_v0 }
   0x9   :  { %v9_v1 = vld [vmem:[#allocation0] sm:$0x3]  }
   0xa   :  { %v21_v2 = vld [vmem:[#allocation0] sm:$0x3]   ;;  %10 = vrot.lane.b32.xlu0 %v9_v1, %s33_s0 }
   0xb   :  { %22 = vrot.lane.b32.xlu1 %v21_v2, %s34_s8  ;;  %v15_v3 = vld [vmem:[#allocation0] sm:$0x3]  }
   0xc   :  { %v6_v4 = vld [vmem:[#allocation0] sm:$0x3]  }
   0xd   :  { %8 = vst.msk [vmem:[%s62_s1] ss:$4 sm:$0x3] %vm7_vm0, %v6_v4  }
  0x12   :  { %16 = vrot.lane.b32.xlu0 %v15_v3, %s35_s9 }
  0x7c   :  { %v11_v5 = vpop.permute.xlu0 %10  }
  0x7d   :  { %v23_v6 = vpop.permute.xlu1 %22   ;;  %27 = vst.msk [vmem:[%s62_s1 + $0x1] ss:$4 sm:$0x3] %vm7_vm0, %v11_v5  }
  0x7e   :  { %29 = vst.msk [vmem:[%s62_s1 + $0x3] ss:$4 sm:$0x3] %vm7_vm0, %v23_v6  }
  0x84   :  { %v17_v7 = vpop.permute.xlu0 %16  }
  0x85   :  { %28 = vst.msk [vmem:[%s62_s1 + $0x2] ss:$4 sm:$0x3] %vm7_vm0, %v17_v7  }

// kernel: bifpn_add2_forward.1
= control target key start
LH: loop header
LB: loop body
LE: loop exit
PB: predicated region body
PF: predicated region fallthrough
CT: control target
= control target key end

     0   :  { %10 = vsyncpa [#allocation3], 0  ;;  %s199_s21 = smov [#allocation2]   ;;  %s262_s0 = inlined_call_operand.vmem [shape: f32[2], index: 0, kind: input, shape index: {}]   ;;  %s263_s1 = inlined_call_operand.vmem [shape: f32[8,256], index: 1, kind: input, shape index: {}]   ;;  %s264_s2 = inlined_call_operand.vmem [shape: f32[8,256], index: 2, kind: input, shape index: {}]   ;;  %s265_s3 = inlined_call_operand.vmem [shape: f32[8,8], index: 3, kind: input, shape index: {}]   ;;  %s266_s4 = inlined_call_operand.vmem [shape: f32[8,1], index: 4, kind: input, shape index: {}]   ;;  %s267_s5 = inlined_call_operand.vmem [shape: f32[8,256], index: 5, kind: output, shape index: {}]  }
   0x1   :  { %s16_s20 = sshll.u32 %s262_s0, 4  ;;  %s17_s20 = int_to_ptr.vmem [resolvable:$true] %s16_s20 }
   0x2   :  { %19 = dma.vmem_to_smem %s17_s20, 16, %s199_s21, [#allocation3]  }
   0x3   :  { %197 = dma.done.wait [#allocation3], 16  }
   0x4   :  { %198 = vsyncadd [#allocation3], 4294967280 }
   0x5   :  { %32 = sfence }
   0x6   :  { %s33_s22 = sld [smem:[#allocation2]]  ;;  %v55_v11 = vld [vmem:[%s263_s1] sm:$0xff]  ;;  %v56_v12 = vld [vmem:[%s263_s1 + $0x8] sm:$0xff]  ;;  %v200_v26 = vmov 0   ;;  %vm114_vm12 = vcmask 64512  }
   0x7   :  { %s234_s23 = sld [smem:[#allocation2 + $0x1]]  ;;  %v60_v13 = vld [vmem:[%s264_s2] sm:$0xff]  ;;  %v61_v14 = vld [vmem:[%s264_s2 + $0x8] sm:$0xff]  ;;  %174 = vset.pattern.permute.xlu0 %v200_v26 }
   0x8   :  { %v108_v25 = vld [vmem:[%s266_s4] sm:$0xff] }
   0x9   :  { %111 = vperm.xlu0 %174, %v108_v25   ;;  %v107_v52 = vld [vmem:[%s265_s3] sm:$0xff] }
   0xd   :  { %s35_s24 = sadd.f32 %s234_s23, %s33_s22 }
   0xf   :  { %s36_s25 = sadd.f32 0.0001, %s35_s24 }
  0x11   :  { %v37_v0 = vstv %s36_s25 }
  0x12   :  { %175 = vrcp.f32 %v37_v0  ;;  %v49_v3 = vand.u32 2147483648, %v37_v0  ;;  %vm43_vm0 = vweird.f32 %v37_v0  ;;  %v47_v5 = vand.u32 2147483647, %v37_v0 }
  0x14   :  { %v50_v7 = vor.u32 1.1754944e-38, %v49_v3  ;;  %vm48_vm3 = vcmp.eq.f32.partialorder %v47_v5, 8.507059e+37 }
  0x18   :  { %v176_v1 = vpop.eup %175 }
  0x19   :  { %v39_v2 = vmul.f32 %v176_v1, %v37_v0  ;;  %vm44_vm1 = vweird.f32 %v176_v1 }
  0x1a   :  { %vm45_vm2 = vmor %vm43_vm0, %vm44_vm1 }
  0x1b   :  { %v40_v4 = vsub.f32 1.0, %v39_v2 }
  0x1d   :  { %v41_v6 = vmul.f32 %v176_v1, %v40_v4 }
  0x1f   :  { %v42_v8 = vadd.f32 %v176_v1, %v41_v6 }
  0x21   :  { %v46_v9 = vsel %vm45_vm2, %v176_v1, %v42_v8 }
  0x22   :  { %v51_v10 = vsel %vm48_vm3, %v50_v7, %v46_v9 }
  0x23   :  { %170 = vpush %v51_v10 }
  0x54   :  { %s171_s0 = spop %170 }
  0x55   :  { %s53_s26 = smul.f32 %s171_s0, %s33_s22 }
  0x56   :  { %s54_s6 = smul.f32 %s171_s0, %s234_s23 }
  0x57   :  { %v57_v15 = vstv %s53_s26 }
  0x58   :  { %v58_v16 = vmul.f32 %v57_v15, %v55_v11  ;;  %v59_v17 = vmul.f32 %v57_v15, %v56_v12  ;;  %v62_v18 = vstv %s54_s6 }
  0x59   :  { %v63_v19 = vmul.f32 %v62_v18, %v60_v13  ;;  %v64_v20 = vmul.f32 %v62_v18, %v61_v14 }
  0x5b   :  { %v65_v21 = vadd.f32 %v63_v19, %v58_v16  ;;  %v66_v22 = vadd.f32 %v64_v20, %v59_v17 }
  0x5d   :  { %v166_v23 = vmul.f32 -1.442695, %v65_v21  ;;  %v167_v24 = vmul.f32 -1.442695, %v66_v22 }
  0x5f   :  { %177 = vpow2.f32 %v166_v23 }
  0x60   :  { %179 = vpow2.f32 %v167_v24 }
  0x65   :  { %v178_v27 = vpop.eup %177 }
  0x66   :  { %v180_v28 = vpop.eup %179  ;;  %v73_v29 = vadd.f32 1.0, %v178_v27 }
  0x67   :  { %v74_v30 = vadd.f32 1.0, %v180_v28 }
  0x68   :  { %181 = vrcp.f32 %v73_v29  ;;  %v86_v36 = vand.u32 2147483648, %v73_v29  ;;  %v84_v39 = vand.u32 2147483647, %v73_v29  ;;  %vm80_vm6 = vweird.f32 %v73_v29 }
  0x69   :  { %183 = vrcp.f32 %v74_v30  ;;  %v101_v40 = vand.u32 2147483648, %v74_v30  ;;  %v99_v42 = vand.u32 2147483647, %v74_v30  ;;  %vm95_vm8 = vweird.f32 %v74_v30 }
  0x6a   :  { %v87_v44 = vor.u32 1.1754944e-38, %v86_v36  ;;  %vm85_vm9 = vcmp.eq.f32.partialorder %v84_v39, 8.507059e+37 }
  0x6b   :  { %v102_v47 = vor.u32 1.1754944e-38, %v101_v40  ;;  %vm100_vm11 = vcmp.eq.f32.partialorder %v99_v42, 8.507059e+37 }
  0x6e   :  { %v182_v31 = vpop.eup %181 }
  0x6f   :  { %v184_v32 = vpop.eup %183  ;;  %v76_v33 = vmul.f32 %v182_v31, %v73_v29  ;;  %vm81_vm4 = vweird.f32 %v182_v31 }
  0x70   :  { %v91_v34 = vmul.f32 %v184_v32, %v74_v30  ;;  %vm96_vm5 = vweird.f32 %v184_v32  ;;  %vm82_vm7 = vmor %vm80_vm6, %vm81_vm4 }
  0x71   :  { %v77_v35 = vsub.f32 1.0, %v76_v33  ;;  %vm97_vm10 = vmor %vm95_vm8, %vm96_vm5 }
  0x72   :  { %v92_v37 = vsub.f32 1.0, %v91_v34 }
  0x73   :  { %v78_v38 = vmul.f32 %v182_v31, %v77_v35 }
  0x74   :  { %v93_v41 = vmul.f32 %v184_v32, %v92_v37 }
  0x75   :  { %v79_v43 = vadd.f32 %v182_v31, %v78_v38 }
  0x76   :  { %v94_v45 = vadd.f32 %v184_v32, %v93_v41 }
  0x77   :  { %v83_v46 = vsel %vm82_vm7, %v182_v31, %v79_v43 }
  0x78   :  { %v88_v48 = vsel %vm85_vm9, %v87_v44, %v83_v46  ;;  %v98_v49 = vsel %vm97_vm10, %v184_v32, %v94_v45 }
  0x79   :  { %v105_v50 = vmul.f32 %v88_v48, %v65_v21  ;;  %v103_v51 = vsel %vm100_vm11, %v102_v47, %v98_v49 }
  0x7a   :  { %v106_v53 = vmul.f32 %v103_v51, %v66_v22 }
  0x7b   :  { %133 = vmatpush.msra.mxu0 %v105_v50  ;;  %v112_v54 = vpop.permute.xlu0 %111 }
  0x7c   :  { %153 = vmatpush.msra.mxu1 %v106_v53  ;;  %168 = vmatmul.msk.f32.vlgmr.msra.gmra.mxu0 %vm114_vm12, %v107_v52 }
  0x7d   :  { %169 = vmatmul.msk.f32.vlgmr.msra.gmra.mxu1 %vm114_vm12, %v107_v52 }
  0xf9   :  { %v135_v55 = vpop.f32.mrf.mxu0 }
  0xfa   :  { %v136_v56 = vadd.f32 %v135_v55, %v112_v54  ;;  %v155_v57 = vpop.f32.mrf.mxu1 }
  0xfb   :  { %v156_v58 = vadd.f32 %v155_v57, %v112_v54 }
  0xfc   :  { %158 = vst [vmem:[%s267_s5] sm:$0xff] %v136_v56 }
  0xfd   :  { %159 = vst [vmem:[%s267_s5 + $0x8] sm:$0xff] %v156_v58 }
  0xfe   :  { %164 = vsyncpa [#allocation3], 1 }

</bundles_post_ra>
